<compile_context>
chip_gen: v7x
topology: tpu7x:2x2x1
jax: 0.10.0
libtpu: 0.0.40
codegen_flags: <defaults>
</compile_context>

<pallas_src>
import functools

import jax
import jax.numpy as jnp
from jax.experimental import pallas as pl
from jax.experimental.pallas import tpu as pltpu

_LANES = 128
_DEFAULT_SCALE = 2.0          # matches Tanhgrow(scale=2.0) default
_MIN_GRID_STEPS = 4           # keep a few blocks so DMA/compute overlap & TCs share work


def _tanhgrow_kernel(x_ref, o_ref, *, scale):
    # Upcast to f32: EUP/VPU have huge slack in a mem-bound kernel, so this is free,
    # and it keeps bf16/f16 numerics on par with PyTorch's fp32-internal tanh.
    x = x_ref[...].astype(jnp.float32)
    o_ref[...] = (x + scale * jnp.tanh(x)).astype(o_ref.dtype)


def _pick_block_bytes_and_vmem_limit():
    """Per-generation block size (per operand) and explicit scoped-VMEM limit."""
    block_bytes = 4 * 1024 * 1024    # v5e / v6e / unknown: 4 MiB per operand
    vmem_limit = 32 * 1024 * 1024    # explicit: v5e's scoped default is only 16 MiB
    try:
        vmem_cap = pltpu.get_tpu_info().vmem_capacity_bytes
        # v7x has 64 MiB VMEM per TensorCore but much faster HBM -> bigger blocks.
        if vmem_cap is not None and vmem_cap <= 96 * 1024 * 1024:
            block_bytes = 8 * 1024 * 1024
            vmem_limit = 48 * 1024 * 1024   # 4 bufs x 8 MiB = 32 MiB, headroom to 48
    except Exception:
        pass  # conservative defaults are safe on every generation
    return block_bytes, vmem_limit


def tanhgrow(x: jax.Array, scale: float = _DEFAULT_SCALE) -> jax.Array:
    """Elementwise x + scale * tanh(x), computed in a Pallas TPU kernel."""
    orig_shape = x.shape
    dtype = x.dtype
    n = x.size
    if n == 0:
        return x
    itemsize = jnp.dtype(dtype).itemsize
    # Sublane tile: 8 rows for 32-bit, 16 for bf16/f16, 32 for 8-bit dtypes.
    sublanes = max(8, 32 // itemsize)

    flat = x.reshape(-1)
    main_n = (n // _LANES) * _LANES

    if main_n == 0:
        # Fewer than 128 elements: a kernel launch is pure overhead; plain jnp.
        x32 = flat.astype(jnp.float32)
        out = (x32 + scale * jnp.tanh(x32)).astype(dtype)
        return out.reshape(orig_shape)

    if main_n == n:
        main_flat = flat          # common path: copy-free
        tail = None
    else:
        main_flat = flat[:main_n]  # lane-aligned prefix for the kernel
        tail = flat[main_n:]       # <128 leftover elements, handled with jnp below

    rows = main_n // _LANES
    x2d = main_flat.reshape(rows, _LANES)

    block_bytes, vmem_limit = _pick_block_bytes_and_vmem_limit()
    block_rows = block_bytes // (_LANES * itemsize)
    block_rows = max(sublanes, (block_rows // sublanes) * sublanes)

    if rows <= 2 * sublanes:
        # Tiny input: one block covering the full array (block == full dims is legal).
        block_rows = rows
    else:
        # Cap block size so the grid has at least _MIN_GRID_STEPS steps: restores
        # DMA/compute pipelining and dual-TC sharding for mid-sized inputs.
        cap = pl.cdiv(rows, _MIN_GRID_STEPS)
        cap = max(sublanes, ((cap + sublanes - 1) // sublanes) * sublanes)
        block_rows = min(block_rows, cap, rows)

    grid = (pl.cdiv(rows, block_rows),)  # ragged final block is masked by Pallas

    out2d = pl.pallas_call(
        functools.partial(_tanhgrow_kernel, scale=scale),
        out_shape=jax.ShapeDtypeStruct((rows, _LANES), dtype),
        grid=grid,
        in_specs=[pl.BlockSpec((block_rows, _LANES), lambda i: (i, 0))],
        out_specs=pl.BlockSpec((block_rows, _LANES), lambda i: (i, 0)),
        compiler_params=pltpu.CompilerParams(
            dimension_semantics=("parallel",),  # shard blocks across TCs (v7x)
            vmem_limit_bytes=vmem_limit,
        ),
    )(x2d)

    out_main = out2d.reshape(main_n)
    if tail is None:
        return out_main.reshape(orig_shape)

    tail32 = tail.astype(jnp.float32)
    out_tail = (tail32 + scale * jnp.tanh(tail32)).astype(dtype)
    return jnp.concatenate([out_main, out_tail]).reshape(orig_shape)


if __name__ == "__main__":
    key = jax.random.PRNGKey(0)

    # NCHW input, consistent with typical Conv2d-pipeline usage of this module.
    x = jax.random.normal(key, (2, 4, 16, 16), dtype=jnp.float32)
    out = tanhgrow(x)
    jax.block_until_ready(out)
    ref = x + _DEFAULT_SCALE * jnp.tanh(x)
    assert out.shape == x.shape and out.dtype == x.dtype
    assert jnp.max(jnp.abs(out - ref)) < 1e-5

    # Non-128-divisible size that still hits the kernel (256-element prefix + 6 tail).
    x2 = jax.random.normal(jax.random.PRNGKey(1), (2, 131), dtype=jnp.float32)
    out2 = tanhgrow(x2)
    jax.block_until_ready(out2)
    ref2 = x2 + _DEFAULT_SCALE * jnp.tanh(x2)
    assert out2.shape == x2.shape and out2.dtype == x2.dtype
    assert jnp.max(jnp.abs(out2 - ref2)) < 1e-5

    # Tiny (<128 elements) pure-jnp fallback path.
    x3 = jax.random.normal(jax.random.PRNGKey(2), (3, 5, 7), dtype=jnp.float32)
    out3 = tanhgrow(x3)
    jax.block_until_ready(out3)
    ref3 = x3 + _DEFAULT_SCALE * jnp.tanh(x3)
    assert out3.shape == x3.shape and out3.dtype == x3.dtype
    assert jnp.max(jnp.abs(out3 - ref3)) < 1e-5

    print("KERNEL_OK")
</pallas_src>

<mosaic_0001>
module attributes {stable_mosaic.version = 11 : i64} {
  func.func @_tanhgrow_kernel(%arg0: i32, %arg1: memref<16x128xf32, #tpu.memory_space<vmem>>, %arg2: memref<16x128xf32, #tpu.memory_space<vmem>>) attributes {dimension_semantics = [#tpu.dimension_semantics<parallel>], iteration_bounds = array<i64: 1>, scalar_prefetch = 0 : i64, scratch_operands = 0 : i64, tpu.core_type = #tpu.core_type<tc>, window_params = [{transform_indices = @transform_0, window_bounds = array<i64: 16, 128>}, {transform_indices = @transform_1, window_bounds = array<i64: 16, 128>}]} {
    %c0 = arith.constant 0 : index
    %c0_0 = arith.constant 0 : index
    %0 = vector.load %arg1[%c0, %c0_0] : memref<16x128xf32, #tpu.memory_space<vmem>>, vector<16x128xf32>
    %1 = math.tanh %0 : vector<16x128xf32>
    %cst = arith.constant 2.000000e+00 : f32
    %2 = vector.broadcast %cst : f32 to vector<16x128xf32>
    %3 = arith.mulf %2, %1 : vector<16x128xf32>
    %4 = arith.addf %0, %3 : vector<16x128xf32>
    %c0_1 = arith.constant 0 : index
    %c0_2 = arith.constant 0 : index
    %5 = vector.load %arg2[%c0_1, %c0_2] : memref<16x128xf32, #tpu.memory_space<vmem>>, vector<16x128xf32>
    tpu.vector_store %arg2[%c0_1, %c0_2], %4 {strides = array<i32>} : memref<16x128xf32, #tpu.memory_space<vmem>>, vector<16x128xf32>,
    return
  }
  func.func @transform_0(%arg0: i32) -> (i32, i32) {
    %c0_i32 = arith.constant 0 : i32
    %c0_i32_0 = arith.constant 0 : i32
    return %arg0, %c0_i32 : i32, i32
  }
  func.func @transform_1(%arg0: i32) -> (i32, i32) {
    %c0_i32 = arith.constant 0 : i32
    %c0_i32_0 = arith.constant 0 : i32
    return %arg0, %c0_i32 : i32, i32
  }
}

</mosaic_0001>

<bundles_post_ra>
// kernel: tpu_custom_call.1
= control target key start
LH: loop header
LB: loop body
LE: loop exit
PB: predicated region body
PF: predicated region fallthrough
CT: control target
= control target key end

     0   :  { %6 = vsyncpa [#allocation3], 0  ;;  %s150_s0 = inlined_call_operand.hbm [shape: f32[16,128], index: 0, kind: input, shape index: {}]   ;;  %s151_s1 = inlined_call_operand.hbm [shape: f32[16,128], index: 1, kind: output, shape index: {}]  }
   0x1   :  { %7 = vsyncpa [#allocation4], 0  ;;  %s106_s6 = smov [#allocation2]   ;;  %s58_s10 = scalar_lea.hbm %s150_s0, 256 }
   0x2   :  { %s13_s7 = sshll.u32 %s106_s6, 4  ;;  %p59_p0 = scmp.ne.s32.totalorder %s150_s0, %s58_s10  ;;  %s14_s7 = int_to_ptr.vmem [resolvable:$true] %s13_s7 }
   0x3   :  { %p62_p1 = scmp.lt.u32.totalorder %s58_s10, %s150_s0 }
   0x5   :  { %p64_p2 = pnand %p62_p1, %p59_p0 }
   0x7   :  { %67 = shalt.err (!%p64_p2)
}
   0x8   :  { %s68_s15 = scalar_lea.vmem %s14_s7, 256  ;;  %p73_p4 = scmp.lt.s32.totalorder %s14_s7, %s14_s7 }
   0x9   :  { %p69_p3 = scmp.ne.s32.totalorder %s14_s7, %s68_s15  ;;  %p74_p5 = scmp.lt.s32.totalorder %s68_s15, %s68_s15 }
   0xb   :  { %p75_p6 = por %p74_p5, %p73_p4 }
   0xd   :  { %p76_p7 = pnand %p75_p6, %p69_p3 }
   0xf   :  { %79 = shalt.err (!%p76_p7)
}
  0x10   :  { %s107_s16 = smov 128   ;;  %s108_s17 = smov 8  }
  0x11   :  { %19 = dma.hbm_to_vmem [thread:$0]  %s150_s0, 256, %s14_s7, [#allocation3], %s107_s16, %s107_s16, %s108_s17  }
  0x12   :  { %102 = dma.done.wait [#allocation3], 256  }
  0x13   :  { %103 = vsyncadd [#allocation3], 4294967040  ;;  %v23_v0 = vld [vmem:[#allocation2] sm:$0xff]  ;;  %v24_v1 = vld [vmem:[#allocation2 + $0x8] sm:$0xff]  ;;  %s109_s20 = smov [#allocation5]  }
  0x14   :  { %54 = vtanh.f32 %v23_v0  ;;  %s38_s21 = sshll.u32 %s109_s20, 4  ;;  %s39_s21 = int_to_ptr.vmem [resolvable:$true] %s38_s21 }
  0x15   :  { %56 = vtanh.f32 %v24_v1  ;;  %s80_s22 = scalar_lea.vmem %s39_s21, 256  ;;  %p85_p9 = scmp.lt.s32.totalorder %s39_s21, %s39_s21 }
  0x16   :  { %p81_p8 = scmp.ne.s32.totalorder %s39_s21, %s80_s22  ;;  %p86_p10 = scmp.lt.s32.totalorder %s80_s22, %s80_s22 }
  0x18   :  { %p87_p11 = por %p86_p10, %p85_p9 }
  0x1a   :  { %p88_p12 = pnand %p87_p11, %p81_p8 }
  0x1e   :  { %v55_v2 = vpop.eup %54 }
  0x1f   :  { %v57_v3 = vpop.eup %56  ;;  %v27_v4 = vmul.f32 2.0, %v55_v2 }
  0x20   :  { %v28_v5 = vmul.f32 2.0, %v57_v3 }
  0x21   :  { %v29_v6 = vadd.f32 %v27_v4, %v23_v0 }
  0x22   :  { %v30_v7 = vadd.f32 %v28_v5, %v24_v1 }
  0x23   :  { %31 = vst [vmem:[#allocation5] sm:$0xff] %v29_v6 }
  0x24   :  { %32 = vst [vmem:[#allocation5 + $0x8] sm:$0xff] %v30_v7 }
  0x25   :  { %91 = shalt.err (!%p88_p12)
}
  0x26   :  { %s92_s24 = scalar_lea.hbm %s151_s1, 256 }
  0x27   :  { %p93_p13 = scmp.ne.s32.totalorder %s151_s1, %s92_s24  ;;  %p96_p0 = scmp.lt.u32.totalorder %s92_s24, %s151_s1 }
  0x29   :  { %p98_p1 = pnand %p96_p0, %p93_p13 }
  0x2b   :  { %101 = shalt.err (!%p98_p1)
}
  0x2c   :  { %44 = dma.vmem_to_hbm [thread:$0]  %s39_s21, 256, %s151_s1, [#allocation4], %s107_s16, %s107_s16, %s108_s17  }
  0x2d   :  { %104 = dma.done.wait [#allocation4], 256  }
  0x2e   :  { %105 = vsyncadd [#allocation4], 4294967040 }
  0x2f   :  { %48 = vsyncpa [#allocation3], 1 }
  0x30   :  { %49 = vsyncpa [#allocation4], 1 }

</bundles_post_ra>
